<compile_context>
chip_gen: v7x
topology: tpu7x:2x2x1
jax: 0.10.0
libtpu: 0.0.40
codegen_flags: <defaults>
</compile_context>

<pallas_src>
import functools

import jax
import jax.numpy as jnp
from jax.experimental import pallas as pl
from jax.experimental.pallas import tpu as pltpu

HIDDEN_SIZE = 128
DEFAULT_TILE_B = 256  # MXU M-dim fill on v6e/v7x; multiple of 128 for v5e.


def _round_up(n, m):
    return ((n + m - 1) // m) * m


def _critic_kernel(x_ref, w1_ref, b1_ref, w2_ref, b2_ref, w3_ref, b3_ref,
                   o_ref, *, compute_dtype):
    # Layer 1 (MXU): [TB, F] @ [F, H] with f32 accumulation; bias+ReLU in f32.
    x = x_ref[...].astype(compute_dtype)
    h1 = jnp.dot(x, w1_ref[...].astype(compute_dtype),
                 preferred_element_type=jnp.float32)
    h1 = jnp.maximum(h1 + b1_ref[...], 0.0)

    # Layer 2 (MXU): [TB, H] @ [H, H]
    h2 = jnp.dot(h1.astype(compute_dtype), w2_ref[...].astype(compute_dtype),
                 preferred_element_type=jnp.float32)
    h2 = jnp.maximum(h2 + b2_ref[...], 0.0)

    # Layer 3: the N=1 matmul is a VPU multiply + lane reduction (XLU) against
    # a (1, H) weight row, plus a scalar bias read from SMEM. No MXU pass.
    out = jnp.sum(h2 * w3_ref[...], axis=-1, keepdims=True) + b3_ref[0, 0]
    o_ref[...] = out.astype(o_ref.dtype)


def critic_forward(x, params, *, tile_b=DEFAULT_TILE_B,
                   compute_dtype=jnp.float32):
    """x: [B, F]. params: pre-transposed weights ([in,out]) + biases."""
    w1, b1, w2, b2, w3, b3 = (
        params["w1"], params["b1"], params["w2"],
        params["b2"], params["w3"], params["b3"],
    )
    B, F = x.shape
    H = w1.shape[1]

    # Pick the batch tile (sublane granularity is 8) and zero-pad B to fit.
    tb = min(tile_b, _round_up(B, 8))
    padded_b = _round_up(B, tb)
    if padded_b != B:
        x = jnp.pad(x, ((0, padded_b - B), (0, 0)))
    num_tiles = padded_b // tb

    flops = 2 * padded_b * (F * H + H * H + H)
    bytes_accessed = (
        padded_b * F * x.dtype.itemsize
        + sum(int(p.size) * p.dtype.itemsize for p in (w1, b1, w2, b2, w3, b3))
        + padded_b * 1 * x.dtype.itemsize
    )

    # Weights/biases: same block every grid step -> stay resident in VMEM.
    resident = lambda shape: pl.BlockSpec(shape, lambda i: (0, 0))

    out = pl.pallas_call(
        functools.partial(_critic_kernel, compute_dtype=compute_dtype),
        out_shape=jax.ShapeDtypeStruct((padded_b, 1), x.dtype),
        grid=(num_tiles,),
        in_specs=[
            pl.BlockSpec((tb, F), lambda i: (i, 0)),             # x tile
            resident((F, H)),                                    # w1
            resident((1, H)),                                    # b1
            resident((H, H)),                                    # w2
            resident((1, H)),                                    # b2
            resident((1, H)),                                    # w3 (row)
            pl.BlockSpec(memory_space=pltpu.MemorySpace.SMEM),   # b3 scalar
        ],
        out_specs=pl.BlockSpec((tb, 1), lambda i: (i, 0)),
        compiler_params=pltpu.CompilerParams(
            dimension_semantics=("parallel",)),
        cost_estimate=pl.CostEstimate(
            flops=int(flops), transcendentals=0,
            bytes_accessed=int(bytes_accessed)),
    )(x, w1, b1, w2, b2, w3, b3)

    return out[:B]


def init_critic_params(key, input_shape, hidden=HIDDEN_SIZE, dtype=jnp.float32):
    """Mirrors PyTorch nn.Linear default init: U(-1/sqrt(fan_in), +1/sqrt(fan_in)).
    Weights stored pre-transposed as [in, out]; w3 stored as a (1, hidden) row."""
    ks = jax.random.split(key, 6)

    def linear(kw, kb, fan_in, fan_out):
        bound = 1.0 / jnp.sqrt(jnp.asarray(fan_in, dtype))
        w = jax.random.uniform(kw, (fan_in, fan_out), dtype, -bound, bound)
        b = jax.random.uniform(kb, (1, fan_out), dtype, -bound, bound)
        return w, b

    w1, b1 = linear(ks[0], ks[1], input_shape, hidden)
    w2, b2 = linear(ks[2], ks[3], hidden, hidden)
    w3_col, b3 = linear(ks[4], ks[5], hidden, 1)
    w3 = w3_col.reshape(1, hidden)  # store as a row for the lane reduction
    return {"w1": w1, "b1": b1, "w2": w2, "b2": b2, "w3": w3, "b3": b3}


def critic_reference(x, p):
    """Pure-JAX reference for correctness checking."""
    h = jnp.maximum(x @ p["w1"] + p["b1"], 0.0)
    h = jnp.maximum(h @ p["w2"] + p["b2"], 0.0)
    return jnp.sum(h * p["w3"], axis=-1, keepdims=True) + p["b3"]


if __name__ == "__main__":
    key = jax.random.PRNGKey(0)
    k_param, k_x, k_x2 = jax.random.split(key, 3)

    F = 32  # == `input_shape` of the module
    params = init_critic_params(k_param, F)

    # Small batch (single grid step, tile == batch).
    x_small = jax.random.normal(k_x, (8, F), dtype=jnp.float32)
    out_small = jax.block_until_ready(critic_forward(x_small, params))
    ref_small = critic_reference(x_small, params)
    assert out_small.shape == (8, 1), out_small.shape
    assert jnp.allclose(out_small, ref_small, atol=1e-5, rtol=1e-5), (
        f"max abs err {jnp.max(jnp.abs(out_small - ref_small))}")

    # Larger, non-multiple batch: exercises the tiled parallel grid + padding.
    x_big = jax.random.normal(k_x2, (300, F), dtype=jnp.float32)
    out_big = jax.block_until_ready(critic_forward(x_big, params))
    ref_big = critic_reference(x_big, params)
    assert out_big.shape == (300, 1), out_big.shape
    assert jnp.allclose(out_big, ref_big, atol=1e-4, rtol=1e-4), (
        f"max abs err {jnp.max(jnp.abs(out_big - ref_big))}")

    # bf16 MXU-input fast path (v6e/v7x): f32 accumulation, looser tolerance.
    out_bf16 = jax.block_until_ready(
        critic_forward(x_big, params, compute_dtype=jnp.bfloat16))
    assert out_bf16.shape == (300, 1), out_bf16.shape
    assert jnp.allclose(out_bf16, ref_big, atol=2e-1, rtol=1e-1), (
        f"max abs err (bf16) {jnp.max(jnp.abs(out_bf16 - ref_big))}")

    print("KERNEL_OK")
</pallas_src>

<mosaic_0001>
module attributes {stable_mosaic.version = 11 : i64} {
  func.func @_critic_kernel(%arg0: i32, %arg1: memref<8x32xf32, #tpu.memory_space<vmem>>, %arg2: memref<32x128xf32, #tpu.memory_space<vmem>>, %arg3: memref<1x128xf32, #tpu.memory_space<vmem>>, %arg4: memref<128x128xf32, #tpu.memory_space<vmem>>, %arg5: memref<1x128xf32, #tpu.memory_space<vmem>>, %arg6: memref<1x128xf32, #tpu.memory_space<vmem>>, %arg7: memref<1x1xf32, #tpu.memory_space<smem>>, %arg8: memref<8x1xf32, #tpu.memory_space<vmem>>) attributes {dimension_semantics = [#tpu.dimension_semantics<parallel>], iteration_bounds = array<i64: 1>, scalar_prefetch = 0 : i64, scratch_operands = 0 : i64, tpu.core_type = #tpu.core_type<tc>, window_params = [{transform_indices = @transform_0, window_bounds = array<i64: 8, 32>}, {pipeline_mode = #tpu.pipeline_mode<synchronous>, transform_indices = @transform_1, window_bounds = array<i64: 32, 128>}, {pipeline_mode = #tpu.pipeline_mode<synchronous>, transform_indices = @transform_2, window_bounds = array<i64: 1, 128>}, {pipeline_mode = #tpu.pipeline_mode<synchronous>, transform_indices = @transform_3, window_bounds = array<i64: 128, 128>}, {pipeline_mode = #tpu.pipeline_mode<synchronous>, transform_indices = @transform_4, window_bounds = array<i64: 1, 128>}, {pipeline_mode = #tpu.pipeline_mode<synchronous>, transform_indices = @transform_5, window_bounds = array<i64: 1, 128>}, {transform_indices = @transform_6, window_bounds = array<i64: 1, 1>}, {transform_indices = @transform_7, window_bounds = array<i64: 8, 1>}]} {
    %c0 = arith.constant 0 : index
    %c0_0 = arith.constant 0 : index
    %0 = vector.load %arg1[%c0, %c0_0] : memref<8x32xf32, #tpu.memory_space<vmem>>, vector<8x32xf32>
    %c0_1 = arith.constant 0 : index
    %c0_2 = arith.constant 0 : index
    %1 = vector.load %arg2[%c0_1, %c0_2] : memref<32x128xf32, #tpu.memory_space<vmem>>, vector<32x128xf32>
    %cst = arith.constant dense<0.000000e+00> : vector<8x128xf32>
    %2 = tpu.matmul %0, %1, %cst {dimension_numbers = #tpu.dot_dimension_numbers<[1], [0], [0], [1], [0, 0, 1, 1], [], []>} : vector<8x32xf32>, vector<32x128xf32>, vector<8x128xf32> -> vector<8x128xf32>
    %c0_3 = arith.constant 0 : index
    %c0_4 = arith.constant 0 : index
    %3 = vector.load %arg3[%c0_3, %c0_4] : memref<1x128xf32, #tpu.memory_space<vmem>>, vector<1x128xf32>
    %4 = vector.broadcast %3 : vector<1x128xf32> to vector<8x128xf32>
    %5 = arith.addf %2, %4 : vector<8x128xf32>
    %cst_5 = arith.constant 0.000000e+00 : f32
    %6 = vector.broadcast %cst_5 : f32 to vector<8x128xf32>
    %7 = arith.maximumf %5, %6 : vector<8x128xf32>
    %c0_6 = arith.constant 0 : index
    %c0_7 = arith.constant 0 : index
    %8 = vector.load %arg4[%c0_6, %c0_7] : memref<128x128xf32, #tpu.memory_space<vmem>>, vector<128x128xf32>
    %cst_8 = arith.constant dense<0.000000e+00> : vector<8x128xf32>
    %9 = tpu.matmul %7, %8, %cst_8 {dimension_numbers = #tpu.dot_dimension_numbers<[1], [0], [0], [1], [0, 0, 1, 1], [], []>} : vector<8x128xf32>, vector<128x128xf32>, vector<8x128xf32> -> vector<8x128xf32>
    %c0_9 = arith.constant 0 : index
    %c0_10 = arith.constant 0 : index
    %10 = vector.load %arg5[%c0_9, %c0_10] : memref<1x128xf32, #tpu.memory_space<vmem>>, vector<1x128xf32>
    %11 = vector.broadcast %10 : vector<1x128xf32> to vector<8x128xf32>
    %12 = arith.addf %9, %11 : vector<8x128xf32>
    %cst_11 = arith.constant 0.000000e+00 : f32
    %13 = vector.broadcast %cst_11 : f32 to vector<8x128xf32>
    %14 = arith.maximumf %12, %13 : vector<8x128xf32>
    %c0_12 = arith.constant 0 : index
    %c0_13 = arith.constant 0 : index
    %15 = vector.load %arg6[%c0_12, %c0_13] : memref<1x128xf32, #tpu.memory_space<vmem>>, vector<1x128xf32>
    %16 = vector.broadcast %15 : vector<1x128xf32> to vector<8x128xf32>
    %17 = arith.mulf %14, %16 : vector<8x128xf32>
    %cst_14 = arith.constant dense<0.000000e+00> : vector<8xf32>
    %18 = vector.multi_reduction <add>, %17, %cst_14 [1] : vector<8x128xf32> to vector<8xf32>
    %19 = vector.shape_cast %18 : vector<8xf32> to vector<8x1xf32>
    %c0_15 = arith.constant 0 : index
    %c0_16 = arith.constant 0 : index
    %20 = memref.load %arg7[%c0_15, %c0_16] : memref<1x1xf32, #tpu.memory_space<smem>>
    %21 = vector.broadcast %20 : f32 to vector<8x1xf32>
    %22 = arith.addf %19, %21 : vector<8x1xf32>
    %c0_17 = arith.constant 0 : index
    %c0_18 = arith.constant 0 : index
    %23 = vector.load %arg8[%c0_17, %c0_18] : memref<8x1xf32, #tpu.memory_space<vmem>>, vector<8x1xf32>
    tpu.vector_store %arg8[%c0_17, %c0_18], %22 {strides = array<i32>} : memref<8x1xf32, #tpu.memory_space<vmem>>, vector<8x1xf32>,
    return
  }
  func.func @transform_0(%arg0: i32) -> (i32, i32) {
    %c0_i32 = arith.constant 0 : i32
    %c0_i32_0 = arith.constant 0 : i32
    return %arg0, %c0_i32 : i32, i32
  }
  func.func @transform_1(%arg0: i32) -> (i32, i32) {
    %c0_i32 = arith.constant 0 : i32
    %c0_i32_0 = arith.constant 0 : i32
    %c0_i32_1 = arith.constant 0 : i32
    return %c0_i32, %c0_i32_0 : i32, i32
  }
  func.func @transform_2(%arg0: i32) -> (i32, i32) {
    %c0_i32 = arith.constant 0 : i32
    %c0_i32_0 = arith.constant 0 : i32
    %c0_i32_1 = arith.constant 0 : i32
    return %c0_i32, %c0_i32_0 : i32, i32
  }
  func.func @transform_3(%arg0: i32) -> (i32, i32) {
    %c0_i32 = arith.constant 0 : i32
    %c0_i32_0 = arith.constant 0 : i32
    %c0_i32_1 = arith.constant 0 : i32
    return %c0_i32, %c0_i32_0 : i32, i32
  }
  func.func @transform_4(%arg0: i32) -> (i32, i32) {
    %c0_i32 = arith.constant 0 : i32
    %c0_i32_0 = arith.constant 0 : i32
    %c0_i32_1 = arith.constant 0 : i32
    return %c0_i32, %c0_i32_0 : i32, i32
  }
  func.func @transform_5(%arg0: i32) -> (i32, i32) {
    %c0_i32 = arith.constant 0 : i32
    %c0_i32_0 = arith.constant 0 : i32
    %c0_i32_1 = arith.constant 0 : i32
    return %c0_i32, %c0_i32_0 : i32, i32
  }
  func.func @transform_6(%arg0: i32) -> (i32, i32) {
    %c0_i32 = arith.constant 0 : i32
    %c0_i32_0 = arith.constant 0 : i32
    %c0_i32_1 = arith.constant 0 : i32
    return %c0_i32, %c0_i32_0 : i32, i32
  }
  func.func @transform_7(%arg0: i32) -> (i32, i32) {
    %c0_i32 = arith.constant 0 : i32
    %c0_i32_0 = arith.constant 0 : i32
    return %arg0, %c0_i32 : i32, i32
  }
}

</mosaic_0001>

<bundles_post_ra>
// kernel: tpu_custom_call.1
= control target key start
LH: loop header
LB: loop body
LE: loop exit
PB: predicated region body
PF: predicated region fallthrough
CT: control target
= control target key end

     0   :  { %13 = vsyncpa [#allocation4], 0  ;;  %s553_s0 = inlined_call_operand.hbm [shape: f32[8,32], index: 0, kind: input, shape index: {}]   ;;  %s554_s1 = inlined_call_operand.hbm [shape: f32[32,128], index: 1, kind: input, shape index: {}]   ;;  %s555_s2 = inlined_call_operand.vmem [shape: f32[1,128], index: 2, kind: input, shape index: {}]   ;;  %s556_s3 = inlined_call_operand.hbm [shape: f32[128,128], index: 3, kind: input, shape index: {}]   ;;  %s557_s4 = inlined_call_operand.vmem [shape: f32[1,128], index: 4, kind: input, shape index: {}]   ;;  %s558_s5 = inlined_call_operand.vmem [shape: f32[1,128], index: 5, kind: input, shape index: {}]   ;;  %s559_s6 = inlined_call_operand.<no memory space> [shape: f32[1,1], index: 6, kind: input, shape index: {}]   ;;  %s560_s7 = inlined_call_operand.vmem [shape: f32[8,1], index: 7, kind: output, shape index: {}]  }
   0x1   :  { %14 = vsyncpa [#allocation6], 0  ;;  %s448_s24 = smov [#allocation5]   ;;  %s378_s28 = scalar_lea.hbm %s554_s1, 512 }
   0x2   :  { %s30_s25 = sshll.u32 %s448_s24, 4  ;;  %p379_p0 = scmp.ne.s32.totalorder %s554_s1, %s378_s28  ;;  %s31_s25 = int_to_ptr.vmem [resolvable:$true] %s30_s25 }
   0x3   :  { %p382_p1 = scmp.lt.u32.totalorder %s378_s28, %s554_s1 }
   0x5   :  { %p384_p2 = pnand %p382_p1, %p379_p0 }
   0x7   :  { %387 = shalt.err (!%p384_p2)
}
   0x8   :  { %s388_s10 = scalar_lea.vmem %s31_s25, 512  ;;  %p393_p4 = scmp.lt.s32.totalorder %s31_s25, %s31_s25 }
   0x9   :  { %p389_p3 = scmp.ne.s32.totalorder %s31_s25, %s388_s10  ;;  %p394_p5 = scmp.lt.s32.totalorder %s388_s10, %s388_s10 }
   0xb   :  { %p395_p6 = por %p394_p5, %p393_p4 }
   0xd   :  { %p396_p7 = pnand %p395_p6, %p389_p3 }
   0xf   :  { %399 = shalt.err (!%p396_p7)
}
  0x10   :  { %s449_s11 = smov 128   ;;  %s450_s12 = smov 8  }
  0x11   :  { %36 = dma.hbm_to_vmem [thread:$0]  %s554_s1, 512, %s31_s25, [#allocation6], %s449_s11, %s449_s11, %s450_s12  }
  0x12   :  { %s451_s15 = smov [#allocation3]   ;;  %s452_s17 = smov [#allocation7]  }
  0x13   :  { %s21_s16 = sshll.u32 %s451_s15, 4  ;;  %s44_s18 = sshll.u32 %s452_s17, 4  ;;  %s22_s16 = int_to_ptr.vmem [resolvable:$true] %s21_s16  ;;  %s45_s18 = int_to_ptr.vmem [resolvable:$true] %s44_s18 }
  0x14   :  { %s400_s21 = scalar_lea.hbm %s553_s0, 128 }
  0x15   :  { %p401_p8 = scmp.ne.s32.totalorder %s553_s0, %s400_s21  ;;  %p404_p9 = scmp.lt.u32.totalorder %s400_s21, %s553_s0 }
  0x17   :  { %p406_p10 = pnand %p404_p9, %p401_p8 }
  0x19   :  { %409 = shalt.err (!%p406_p10)
}
  0x1a   :  { %s410_s1 = scalar_lea.vmem %s22_s16, 128  ;;  %p415_p12 = scmp.lt.s32.totalorder %s22_s16, %s22_s16 }
  0x1b   :  { %p411_p11 = scmp.ne.s32.totalorder %s22_s16, %s410_s1  ;;  %p416_p13 = scmp.lt.s32.totalorder %s410_s1, %s410_s1 }
  0x1d   :  { %p417_p0 = por %p416_p13, %p415_p12 }
  0x1f   :  { %p418_p1 = pnand %p417_p0, %p411_p11 }
  0x21   :  { %421 = shalt.err (!%p418_p1)
}
  0x22   :  { %24 = dma.hbm_to_vmem [thread:$0]  %s553_s0, 128, %s22_s16, [#allocation4]  }
  0x23   :  { %s422_s30 = scalar_lea.hbm %s556_s3, 2048 }
  0x24   :  { %p423_p2 = scmp.ne.s32.totalorder %s556_s3, %s422_s30  ;;  %p426_p3 = scmp.lt.u32.totalorder %s422_s30, %s556_s3 }
  0x26   :  { %p428_p4 = pnand %p426_p3, %p423_p2 }
  0x28   :  { %431 = shalt.err (!%p428_p4)
}
  0x29   :  { %s432_s14 = scalar_lea.vmem %s45_s18, 2048  ;;  %p437_p6 = scmp.lt.s32.totalorder %s45_s18, %s45_s18 }
  0x2a   :  { %p433_p5 = scmp.ne.s32.totalorder %s45_s18, %s432_s14  ;;  %p438_p7 = scmp.lt.s32.totalorder %s432_s14, %s432_s14 }
  0x2c   :  { %p439_p8 = por %p438_p7, %p437_p6 }
  0x2e   :  { %p440_p9 = pnand %p439_p8, %p433_p5 }
  0x30   :  { %443 = shalt.err (!%p440_p9)
}
  0x31   :  { %50 = dma.hbm_to_vmem [thread:$0]  %s556_s3, 2048, %s45_s18, [#allocation6], %s449_s11, %s449_s11, %s450_s12  }
  0x32   :  { %444 = dma.done.wait [#allocation4], 128  }
  0x33   :  { %445 = vsyncadd [#allocation4], 4294967168 }
  0x34   :  { %446 = dma.done.wait [#allocation6], 2560  }
  0x35   :  { %447 = vsyncadd [#allocation6], 4294964736  ;;  %v453_v0 = vmov 0.0|0.0   ;;  %vm454_vm0 = vmmov 0   ;;  %v455_v1 = vmov 0.0   ;;  %v67_v2 = vld [vmem:[#allocation5] sm:$0xff]  ;;  %v258_v45 = vstv %s559_s6 }
  0x36   :  { %340 = vmatprep.subr.bf16.mxu0 %v453_v0  ;;  %302 = vmatprep.mubr.msk.f32.mxu0 %vm454_vm0, %v455_v1  ;;  %v68_v3 = vld [vmem:[#allocation5 + $0x8] sm:$0xff]  ;;  %v69_v4 = vld [vmem:[#allocation5 + $0x10] sm:$0xff]  ;;  %v70_v6 = vld [vmem:[#allocation5 + $0x18] sm:$0xff]  ;;  %vm78_vm1 = vcmask 261120   ;;  %vm260_vm2 = vcmask 7168  }
  0x37   :  { %346 = vmatprep.subr.bf16.mxu1 %v453_v0  ;;  %337 = vmatprep.mubr.msk.f32.mxu1 %vm454_vm0, %v455_v1  ;;  %v341_v5 = vpack.c.bf16 %v68_v3, %v67_v2  ;;  %v153_v7 = vld [vmem:[#allocation7] sm:$0xff]  ;;  %v154_v8 = vld [vmem:[#allocation7 + $0x8] sm:$0xff]  ;;  %v155_v9 = vld [vmem:[#allocation7 + $0x10] sm:$0xff]  ;;  %v344_v11 = vpack.c.bf16 %v70_v6, %v69_v4 }
  0x38   :  { %v156_v10 = vld [vmem:[#allocation7 + $0x18] sm:$0xff]  ;;  %v347_v12 = vpack.c.bf16 %v154_v8, %v153_v7  ;;  %v157_v14 = vld [vmem:[#allocation7 + $0x20] sm:$0xff]  ;;  %v158_v15 = vld [vmem:[#allocation7 + $0x28] sm:$0xff] }
  0x39   :  { %342 = vmatpush3.bf16.msra.mxu0 %v341_v5  ;;  %v350_v13 = vpack.c.bf16 %v156_v10, %v155_v9  ;;  %v66_v16 = vld [vmem:[#allocation3] sm:$0xff]  ;;  %v353_v17 = vpack.c.bf16 %v158_v15, %v157_v14  ;;  %v159_v18 = vld [vmem:[#allocation7 + $0x30] sm:$0xff]  ;;  %v161_v21 = vld [vmem:[#allocation7 + $0x40] sm:$0xff] }
  0x3a   :  { %343 = vmatprep.subr.bf16.mxu0 %v453_v0  ;;  %348 = vmatpush3.bf16.msra.mxu1 %v347_v12  ;;  %v160_v19 = vld [vmem:[#allocation7 + $0x38] sm:$0xff]  ;;  %v162_v22 = vld [vmem:[#allocation7 + $0x48] sm:$0xff]  ;;  %v163_v24 = vld [vmem:[#allocation7 + $0x50] sm:$0xff] }
  0x3b   :  { %349 = vmatprep.subr.bf16.mxu1 %v453_v0  ;;  %v356_v20 = vpack.c.bf16 %v160_v19, %v159_v18  ;;  %v359_v23 = vpack.c.bf16 %v162_v22, %v161_v21  ;;  %v164_v25 = vld [vmem:[#allocation7 + $0x58] sm:$0xff]  ;;  %v165_v27 = vld [vmem:[#allocation7 + $0x60] sm:$0xff]  ;;  %v166_v28 = vld [vmem:[#allocation7 + $0x68] sm:$0xff] }
  0x3c   :  { %v362_v26 = vpack.c.bf16 %v164_v25, %v163_v24  ;;  %v365_v29 = vpack.c.bf16 %v166_v28, %v165_v27  ;;  %v167_v30 = vld [vmem:[#allocation7 + $0x70] sm:$0xff]  ;;  %v168_v31 = vld [vmem:[#allocation7 + $0x78] sm:$0xff] }
  0x3d   :  { %345 = vmatpush3.bf16.msra.mxu0 %v344_v11  ;;  %v368_v32 = vpack.c.bf16 %v168_v31, %v167_v30  ;;  %v268_v33 = vld [vmem:[%s555_s2] ss:$0 sm:$0xff] }
  0x3e   :  { %351 = vmatpush3.bf16.msra.mxu1 %v350_v13  ;;  %v270_v38 = vld [vmem:[%s557_s4] ss:$0 sm:$0xff] }
  0x3f   :  { %352 = vmatprep.subr.bf16.mxu1 %v453_v0  ;;  %v271_v42 = vld [vmem:[%s558_s5] ss:$0 sm:$0xff] }
  0x40   :  { %303 = vmatmul.mubr.msk.f32.vlgmr.msra.gmra.mrb[0].mxu0 %vm78_vm1, %v66_v16 }
  0x42   :  { %354 = vmatpush3.bf16.msra.mxu1 %v353_v17 }
  0x43   :  { %355 = vmatprep.subr.bf16.mxu1 %v453_v0 }
  0x46   :  { %357 = vmatpush3.bf16.msra.mxu1 %v356_v20 }
  0x47   :  { %358 = vmatprep.subr.bf16.mxu1 %v453_v0 }
  0x4a   :  { %360 = vmatpush3.bf16.msra.mxu1 %v359_v23 }
  0x4b   :  { %361 = vmatprep.subr.bf16.mxu1 %v453_v0 }
  0x4e   :  { %363 = vmatpush3.bf16.msra.mxu1 %v362_v26 }
  0x4f   :  { %364 = vmatprep.subr.bf16.mxu1 %v453_v0 }
  0x52   :  { %366 = vmatpush3.bf16.msra.mxu1 %v365_v29 }
  0x53   :  { %367 = vmatprep.subr.bf16.mxu1 %v453_v0 }
  0x56   :  { %369 = vmatpush3.bf16.msra.mxu1 %v368_v32 }
 0x113   :  { %v148_v34 = vpop.f32.mrb[0].mxu0 }
 0x114   :  { %v149_v35 = vadd.f32 %v268_v33, %v148_v34  ;;  %v304_v36 = vpop.f32.mrb[1].mxu0 }
 0x116   :  { %v152_v37 = vmax.f32 %v149_v35, 0.0 }
 0x118   :  { %338 = vmatmul.mubr.f32.vlgmr.msra.gmra.mrb[0].mxu1 %v152_v37 }
 0x1eb   :  { %v242_v39 = vpop.f32.mrb[0].mxu1 }
 0x1ec   :  { %v243_v40 = vadd.f32 %v270_v38, %v242_v39  ;;  %v339_v41 = vpop.f32.mrb[1].mxu1 }
 0x1ee   :  { %v246_v43 = vmax.f32 %v243_v40, 0.0 }
 0x1f0   :  { %v254_v44 = vmul.f32 %v271_v42, %v246_v43 }
 0x1f2   :  { %255 = vadd.xlane.f32.xlu0 %v254_v44 }
 0x27f   :  { %v256_v46 = vpop.xlane.xlu0 %255 }
 0x280   :  { %v259_v47 = vadd.f32 %v258_v45, %v256_v46 }
 0x282   :  { %261 = vst.msk [vmem:[%s560_s7] sm:$0xff] %vm260_vm2, %v259_v47 }
 0x283   :  { %266 = vsyncpa [#allocation4], 1 }
 0x284   :  { %267 = vsyncpa [#allocation6], 1 }

</bundles_post_ra>
